<compile_context>
chip_gen: v5e
topology: v5e:2x2
jax: 0.10.0
libtpu: 0.0.40
codegen_flags: <defaults>
</compile_context>

<pallas_src>
import functools

import jax
import jax.numpy as jnp
from jax.experimental import pallas as pl
from jax.experimental.pallas import tpu as pltpu


def _mlp_kernel(x_ref, w1_ref, b1_ref, w2_ref, b2_ref, w3_ref, b3_ref, o_ref):
    # Batch-major layout: x_ref is (tb, 6); weights are pre-transposed to (in, out) in
    # the wrapper and biases reshaped to (1, out), so y = x @ Wt + b reproduces
    # nn.Linear (y = x @ W.T + b) exactly.
    x = x_ref[...]                                                               # (tb, 6)
    h1 = jnp.dot(x, w1_ref[...], preferred_element_type=jnp.float32) + b1_ref[...]   # (tb, 8)
    h1 = jnp.maximum(h1, 0.0)
    h2 = jnp.dot(h1, w2_ref[...], preferred_element_type=jnp.float32) + b2_ref[...]  # (tb, 4)
    h2 = jnp.maximum(h2, 0.0)
    o_ref[...] = jnp.dot(h2, w3_ref[...], preferred_element_type=jnp.float32) + b3_ref[...]


def _round_up(n, m):
    return pl.cdiv(n, m) * m


@functools.partial(jax.jit, static_argnames=("tile_b",))
def vulnerability_nn_forward(x, params, *, tile_b=16384):
    """x: [B, 6] float32.  params: PyTorch layout, W (out, in) and b (out,)."""
    B = x.shape[0]
    x = x.astype(jnp.float32)

    # Tiny one-time layout plumbing on the 6->8->4->4 parameters (a few hundred bytes).
    w1t = params["w1"].T.astype(jnp.float32)            # (6, 8)
    w2t = params["w2"].T.astype(jnp.float32)            # (8, 4)
    w3t = params["w3"].T.astype(jnp.float32)            # (4, 4)
    b1 = params["b1"].reshape(1, -1).astype(jnp.float32)   # (1, 8)
    b2 = params["b2"].reshape(1, -1).astype(jnp.float32)   # (1, 4)
    b3 = params["b3"].reshape(1, -1).astype(jnp.float32)   # (1, 4)

    # Tile selection:
    #  - round to a multiple of 128 (block sublane dim must be a multiple of 8; 128 also
    #    keeps DMA granularity friendly and guards against odd user-supplied tile_b),
    #  - never bigger than the (rounded) batch,
    #  - give batches that span more than one tile at least 2 grid steps (megacore).
    tb = min(int(tile_b), _round_up(B, 128))
    if B > 2 * 128:
        tb = min(tb, _round_up(pl.cdiv(B, 2), 128))
    tb = _round_up(max(tb, 128), 128)
    grid = (pl.cdiv(B, tb),)                             # ragged tail -> clipped last block

    # Full-array parameter blocks with constant index_maps (DMA elided after step 0).
    full = lambda a: pl.BlockSpec(a.shape, lambda i: (0,) * a.ndim)

    # VMEM accounting: (tb, 6) and (tb, 4) f32 blocks both pad to 128 lanes -> 512 B/row
    # each, double-buffered.  Leave headroom for the tiny parameter blocks + scratch.
    blk_bytes = tb * 128 * 4
    vmem_limit = int(min(max(2 * (blk_bytes + blk_bytes) + (4 << 20), 32 << 20), 96 << 20))

    out = pl.pallas_call(
        _mlp_kernel,
        out_shape=jax.ShapeDtypeStruct((B, 4), jnp.float32),
        grid_spec=pltpu.PrefetchScalarGridSpec(
            num_scalar_prefetch=0,
            grid=grid,
            in_specs=[
                pl.BlockSpec((tb, 6), lambda i: (i, 0)),   # x tile, batch on sublanes
                full(w1t), full(b1), full(w2t), full(b2), full(w3t), full(b3),
            ],
            out_specs=pl.BlockSpec((tb, 4), lambda i: (i, 0)),
        ),
        compiler_params=pltpu.CompilerParams(
            dimension_semantics=("parallel",),             # shards across both TCs on v7x
            vmem_limit_bytes=vmem_limit,
        ),
        cost_estimate=pl.CostEstimate(
            flops=208 * B, transcendentals=0, bytes_accessed=40 * B),
    )(x, w1t, b1, w2t, b2, w3t, b3)

    return out                                             # (B, 4), caller layout, no copies


def init_params(key):
    """Deterministic synthetic parameters, PyTorch layout: W (out, in), b (out,)."""
    ks = jax.random.split(key, 6)
    def lin(kw, kb, fan_in, fan_out):
        bound = 1.0 / jnp.sqrt(fan_in)                     # matches torch Linear default bound
        w = jax.random.uniform(kw, (fan_out, fan_in), jnp.float32, -bound, bound)
        b = jax.random.uniform(kb, (fan_out,), jnp.float32, -bound, bound)
        return w, b
    w1, b1 = lin(ks[0], ks[1], 6, 8)
    w2, b2 = lin(ks[2], ks[3], 8, 4)
    w3, b3 = lin(ks[4], ks[5], 4, 4)
    return {"w1": w1, "b1": b1, "w2": w2, "b2": b2, "w3": w3, "b3": b3}


def _reference(x, p):
    h1 = jnp.maximum(x @ p["w1"].T + p["b1"], 0.0)
    h2 = jnp.maximum(h1 @ p["w2"].T + p["b2"], 0.0)
    return h2 @ p["w3"].T + p["b3"]
    # NOTE: the module's self.softmax is defined but never used in forward().


if __name__ == "__main__":
    key = jax.random.PRNGKey(0)
    kx, kp = jax.random.split(key)
    params = init_params(kp)

    # Small batch (heavy block clipping: one 128-row block over 2 rows).
    B = 2
    x = jax.random.normal(kx, (B, 6), jnp.float32)
    out = jax.block_until_ready(vulnerability_nn_forward(x, params))
    assert out.shape == (B, 4)
    assert jnp.allclose(out, _reference(x, params), atol=1e-5, rtol=1e-5)

    # Multi-tile batch with a ragged tail (exercises the clipped last block + megacore path).
    B2 = 3000
    x2 = jax.random.normal(kx, (B2, 6), jnp.float32)
    out2 = jax.block_until_ready(vulnerability_nn_forward(x2, params, tile_b=1024))
    assert out2.shape == (B2, 4)
    assert jnp.allclose(out2, _reference(x2, params), atol=1e-5, rtol=1e-5)

    print("KERNEL_OK")
</pallas_src>

<mosaic_0001>
module attributes {stable_mosaic.version = 11 : i64} {
  func.func @_mlp_kernel(%arg0: i32, %arg1: memref<128x6xf32, #tpu.memory_space<vmem>>, %arg2: memref<6x8xf32, #tpu.memory_space<vmem>>, %arg3: memref<1x8xf32, #tpu.memory_space<vmem>>, %arg4: memref<8x4xf32, #tpu.memory_space<vmem>>, %arg5: memref<1x4xf32, #tpu.memory_space<vmem>>, %arg6: memref<4x4xf32, #tpu.memory_space<vmem>>, %arg7: memref<1x4xf32, #tpu.memory_space<vmem>>, %arg8: memref<128x4xf32, #tpu.memory_space<vmem>>) attributes {dimension_semantics = [#tpu.dimension_semantics<parallel>], iteration_bounds = array<i64: 1>, scalar_prefetch = 0 : i64, scratch_operands = 0 : i64, tpu.core_type = #tpu.core_type<tc>, window_params = [{transform_indices = @transform_0, window_bounds = array<i64: 128, 6>}, {pipeline_mode = #tpu.pipeline_mode<synchronous>, transform_indices = @transform_1, window_bounds = array<i64: 6, 8>}, {pipeline_mode = #tpu.pipeline_mode<synchronous>, transform_indices = @transform_2, window_bounds = array<i64: 1, 8>}, {pipeline_mode = #tpu.pipeline_mode<synchronous>, transform_indices = @transform_3, window_bounds = array<i64: 8, 4>}, {pipeline_mode = #tpu.pipeline_mode<synchronous>, transform_indices = @transform_4, window_bounds = array<i64: 1, 4>}, {pipeline_mode = #tpu.pipeline_mode<synchronous>, transform_indices = @transform_5, window_bounds = array<i64: 4, 4>}, {pipeline_mode = #tpu.pipeline_mode<synchronous>, transform_indices = @transform_6, window_bounds = array<i64: 1, 4>}, {transform_indices = @transform_7, window_bounds = array<i64: 128, 4>}]} {
    %c0 = arith.constant 0 : index
    %c0_0 = arith.constant 0 : index
    %0 = vector.load %arg1[%c0, %c0_0] : memref<128x6xf32, #tpu.memory_space<vmem>>, vector<128x6xf32>
    %c0_1 = arith.constant 0 : index
    %c0_2 = arith.constant 0 : index
    %1 = vector.load %arg2[%c0_1, %c0_2] : memref<6x8xf32, #tpu.memory_space<vmem>>, vector<6x8xf32>
    %cst = arith.constant dense<0.000000e+00> : vector<128x8xf32>
    %2 = tpu.matmul %0, %1, %cst {dimension_numbers = #tpu.dot_dimension_numbers<[1], [0], [0], [1], [0, 0, 1, 1], [], []>} : vector<128x6xf32>, vector<6x8xf32>, vector<128x8xf32> -> vector<128x8xf32>
    %c0_3 = arith.constant 0 : index
    %c0_4 = arith.constant 0 : index
    %3 = vector.load %arg3[%c0_3, %c0_4] : memref<1x8xf32, #tpu.memory_space<vmem>>, vector<1x8xf32>
    %4 = vector.broadcast %3 : vector<1x8xf32> to vector<128x8xf32>
    %5 = arith.addf %2, %4 : vector<128x8xf32>
    %cst_5 = arith.constant 0.000000e+00 : f32
    %6 = vector.broadcast %cst_5 : f32 to vector<128x8xf32>
    %7 = arith.maximumf %5, %6 : vector<128x8xf32>
    %c0_6 = arith.constant 0 : index
    %c0_7 = arith.constant 0 : index
    %8 = vector.load %arg4[%c0_6, %c0_7] : memref<8x4xf32, #tpu.memory_space<vmem>>, vector<8x4xf32>
    %cst_8 = arith.constant dense<0.000000e+00> : vector<128x4xf32>
    %9 = tpu.matmul %7, %8, %cst_8 {dimension_numbers = #tpu.dot_dimension_numbers<[1], [0], [0], [1], [0, 0, 1, 1], [], []>} : vector<128x8xf32>, vector<8x4xf32>, vector<128x4xf32> -> vector<128x4xf32>
    %c0_9 = arith.constant 0 : index
    %c0_10 = arith.constant 0 : index
    %10 = vector.load %arg5[%c0_9, %c0_10] : memref<1x4xf32, #tpu.memory_space<vmem>>, vector<1x4xf32>
    %11 = vector.broadcast %10 : vector<1x4xf32> to vector<128x4xf32>
    %12 = arith.addf %9, %11 : vector<128x4xf32>
    %cst_11 = arith.constant 0.000000e+00 : f32
    %13 = vector.broadcast %cst_11 : f32 to vector<128x4xf32>
    %14 = arith.maximumf %12, %13 : vector<128x4xf32>
    %c0_12 = arith.constant 0 : index
    %c0_13 = arith.constant 0 : index
    %15 = vector.load %arg6[%c0_12, %c0_13] : memref<4x4xf32, #tpu.memory_space<vmem>>, vector<4x4xf32>
    %cst_14 = arith.constant dense<0.000000e+00> : vector<128x4xf32>
    %16 = tpu.matmul %14, %15, %cst_14 {dimension_numbers = #tpu.dot_dimension_numbers<[1], [0], [0], [1], [0, 0, 1, 1], [], []>} : vector<128x4xf32>, vector<4x4xf32>, vector<128x4xf32> -> vector<128x4xf32>
    %c0_15 = arith.constant 0 : index
    %c0_16 = arith.constant 0 : index
    %17 = vector.load %arg7[%c0_15, %c0_16] : memref<1x4xf32, #tpu.memory_space<vmem>>, vector<1x4xf32>
    %18 = vector.broadcast %17 : vector<1x4xf32> to vector<128x4xf32>
    %19 = arith.addf %16, %18 : vector<128x4xf32>
    %c0_17 = arith.constant 0 : index
    %c0_18 = arith.constant 0 : index
    %20 = vector.load %arg8[%c0_17, %c0_18] : memref<128x4xf32, #tpu.memory_space<vmem>>, vector<128x4xf32>
    tpu.vector_store %arg8[%c0_17, %c0_18], %19 {strides = array<i32>} : memref<128x4xf32, #tpu.memory_space<vmem>>, vector<128x4xf32>,
    return
  }
  func.func @transform_0(%arg0: i32) -> (i32, i32) {
    %c0_i32 = arith.constant 0 : i32
    %c0_i32_0 = arith.constant 0 : i32
    return %arg0, %c0_i32 : i32, i32
  }
  func.func @transform_1(%arg0: i32) -> (i32, i32) {
    %c0_i32 = arith.constant 0 : i32
    %c0_i32_0 = arith.constant 0 : i32
    %c0_i32_1 = arith.constant 0 : i32
    return %c0_i32, %c0_i32_0 : i32, i32
  }
  func.func @transform_2(%arg0: i32) -> (i32, i32) {
    %c0_i32 = arith.constant 0 : i32
    %c0_i32_0 = arith.constant 0 : i32
    %c0_i32_1 = arith.constant 0 : i32
    return %c0_i32, %c0_i32_0 : i32, i32
  }
  func.func @transform_3(%arg0: i32) -> (i32, i32) {
    %c0_i32 = arith.constant 0 : i32
    %c0_i32_0 = arith.constant 0 : i32
    %c0_i32_1 = arith.constant 0 : i32
    return %c0_i32, %c0_i32_0 : i32, i32
  }
  func.func @transform_4(%arg0: i32) -> (i32, i32) {
    %c0_i32 = arith.constant 0 : i32
    %c0_i32_0 = arith.constant 0 : i32
    %c0_i32_1 = arith.constant 0 : i32
    return %c0_i32, %c0_i32_0 : i32, i32
  }
  func.func @transform_5(%arg0: i32) -> (i32, i32) {
    %c0_i32 = arith.constant 0 : i32
    %c0_i32_0 = arith.constant 0 : i32
    %c0_i32_1 = arith.constant 0 : i32
    return %c0_i32, %c0_i32_0 : i32, i32
  }
  func.func @transform_6(%arg0: i32) -> (i32, i32) {
    %c0_i32 = arith.constant 0 : i32
    %c0_i32_0 = arith.constant 0 : i32
    %c0_i32_1 = arith.constant 0 : i32
    return %c0_i32, %c0_i32_0 : i32, i32
  }
  func.func @transform_7(%arg0: i32) -> (i32, i32) {
    %c0_i32 = arith.constant 0 : i32
    %c0_i32_0 = arith.constant 0 : i32
    return %arg0, %c0_i32 : i32, i32
  }
}

</mosaic_0001>

<bundles_post_ra>
// kernel: vulnerability_nn_forward.1
= control target key start
LH: loop header
LB: loop body
LE: loop exit
PB: predicated region body
PF: predicated region fallthrough
CT: control target
= control target key end

     0   :  { %12 = vsyncpa [#allocation3], 0  ;;  %vm97_vm0 = vcmask 1045504   ;;  %vm48_vm1 = vcmask 48128   ;;  %vm187_vm2 = vcmask 64512   ;;  %vm371_vm3 = vcmask 1043456   ;;  %s771_s0 = inlined_call_operand.vmem [shape: f32[2,6], index: 0, kind: input, shape index: {}]   ;;  %s772_s1 = inlined_call_operand.vmem [shape: f32[6,8], index: 1, kind: input, shape index: {}]   ;;  %s773_s2 = inlined_call_operand.vmem [shape: f32[1,8], index: 2, kind: input, shape index: {}]   ;;  %s774_s3 = inlined_call_operand.vmem [shape: f32[8,4], index: 3, kind: input, shape index: {}]   ;;  %s775_s4 = inlined_call_operand.vmem [shape: f32[1,4], index: 4, kind: input, shape index: {}]   ;;  %s776_s5 = inlined_call_operand.vmem [shape: f32[4,4], index: 5, kind: input, shape index: {}]   ;;  %s777_s6 = inlined_call_operand.vmem [shape: f32[1,4], index: 6, kind: input, shape index: {}]   ;;  %s778_s7 = inlined_call_operand.hbm [shape: f32[2,4], index: 7, kind: output, shape index: {}]  }
   0x1   :  { %v43_v0 = vld [vmem:[%s772_s1] sm:$0x3f]  ;;  %v28_v2 = vld [vmem:[%s771_s0 + $0x8] sm:$0xff]  ;;  %v29_v3 = vld [vmem:[%s771_s0 + $0x10] sm:$0xff]  ;;  %vm322_vm4 = vcmask 31744  }
   0x2   :  { %v27_v1 = vld [vmem:[%s771_s0] sm:$0xff]  ;;  %474 = vmatpush.msk.msra.mxu0 %vm97_vm0, %v43_v0  ;;  %524 = vmatpush.msk.msra.mxu3 %vm97_vm0, %v43_v0  ;;  %v30_v5 = vld [vmem:[%s771_s0 + $0x18] sm:$0xff]  ;;  %v40_v6 = vld [vmem:[%s771_s0 + $0x68] sm:$0xff] }
   0x3   :  { %475 = vmatmul.msk.f32.vlgmr.msra.gmra.mxu0 %vm48_vm1, %v27_v1  ;;  %v39_v4 = vld [vmem:[%s771_s0 + $0x60] sm:$0xff]  ;;  %v41_v8 = vld [vmem:[%s771_s0 + $0x70] sm:$0xff]  ;;  %v32_v9 = vld [vmem:[%s771_s0 + $0x28] sm:$0xff] }
   0x4   :  { %487 = vmatmul.msk.f32.vlgmr.msra.gmra.mxu3 %vm48_vm1, %v39_v4  ;;  %v31_v7 = vld [vmem:[%s771_s0 + $0x20] sm:$0xff]  ;;  %v42_v10 = vld [vmem:[%s771_s0 + $0x78] sm:$0xff]  ;;  %v33_v11 = vld [vmem:[%s771_s0 + $0x30] sm:$0xff] }
   0x5   :  { %v34_v12 = vld [vmem:[%s771_s0 + $0x38] sm:$0xff]  ;;  %v35_v13 = vld [vmem:[%s771_s0 + $0x40] sm:$0xff]  ;;  %v36_v14 = vld [vmem:[%s771_s0 + $0x48] sm:$0xff] }
   0x6   :  { %v37_v15 = vld [vmem:[%s771_s0 + $0x50] sm:$0xff]  ;;  %v38_v16 = vld [vmem:[%s771_s0 + $0x58] sm:$0xff]  ;;  %v182_v17 = vld [vmem:[%s774_s3] sm:$0xff] }
   0x7   :  { %251 = vmatpush.msra.mxu1 %v182_v17  ;;  %525 = vmatpush.msrb.mxu3 %v182_v17  ;;  %v675_v18 = vld [vmem:[%s773_s2] ss:$0 sm:$0xff] }
   0x8   :  { %v715_v4 = vld [vmem:[%s775_s4] ss:$0 sm:$0xff] }
   0xb   :  { %476 = vmatmul.msk.f32.gmra.mxu0 %vm48_vm1, %v28_v2 }
   0xc   :  { %488 = vmatmul.msk.f32.gmra.mxu3 %vm48_vm1, %v40_v6 }
  0x13   :  { %477 = vmatmul.msk.f32.gmra.mxu0 %vm48_vm1, %v29_v3  ;;  %v317_v3 = vld [vmem:[%s776_s5] sm:$0xf] }
  0x14   :  { %489 = vmatmul.msk.f32.gmra.mxu3 %vm48_vm1, %v41_v8  ;;  %507 = vmatpush.msk.msra.mxu2 %vm371_vm3, %v317_v3 }
  0x15   :  { %526 = vmatpush.msk.msra.mxu3 %vm371_vm3, %v317_v3 }
  0x1b   :  { %478 = vmatmul.msk.f32.gmra.mxu0 %vm48_vm1, %v30_v5 }
  0x1c   :  { %490 = vmatmul.msk.f32.gmra.mxu3 %vm48_vm1, %v42_v10 }
  0x23   :  { %479 = vmatmul.msk.f32.gmra.mxu0 %vm48_vm1, %v31_v7 }
  0x2b   :  { %480 = vmatmul.msk.f32.gmra.mxu0 %vm48_vm1, %v32_v9 }
  0x33   :  { %481 = vmatmul.msk.f32.gmra.mxu0 %vm48_vm1, %v33_v11 }
  0x3b   :  { %482 = vmatmul.msk.f32.gmra.mxu0 %vm48_vm1, %v34_v12 }
  0x43   :  { %483 = vmatmul.msk.f32.gmra.mxu0 %vm48_vm1, %v35_v13 }
  0x4b   :  { %484 = vmatmul.msk.f32.gmra.mxu0 %vm48_vm1, %v36_v14 }
  0x53   :  { %485 = vmatmul.msk.f32.gmra.mxu0 %vm48_vm1, %v37_v15 }
  0x5b   :  { %486 = vmatmul.msk.f32.gmra.mxu0 %vm48_vm1, %v38_v16 }
  0x80   :  { %v118_v19 = vpop.f32.mrf.mxu0 }
  0x81   :  { %v119_v20 = vadd.f32 %v675_v18, %v118_v19 }
  0x83   :  { %v166_v21 = vmax.f32 %v119_v20, 0.0 }
  0x85   :  { %491 = vmatmul.msk.f32.vlgmr.msra.gmra.mxu1 %vm187_vm2, %v166_v21 }
  0x87   :  { %v154_v30 = vpop.f32.mrf.mxu3 }
  0x88   :  { %v121_v22 = vpop.f32.mrf.mxu0  ;;  %v155_v32 = vadd.f32 %v675_v18, %v154_v30 }
  0x89   :  { %v122_v23 = vadd.f32 %v675_v18, %v121_v22 }
  0x8a   :  { %v178_v33 = vmax.f32 %v155_v32, 0.0 }
  0x8b   :  { %v167_v24 = vmax.f32 %v122_v23, 0.0 }
  0x8c   :  { %503 = vmatmul.msk.f32.vlgmr.msrb.gmra.mxu3 %vm187_vm2, %v178_v33 }
  0x8d   :  { %492 = vmatmul.msk.f32.gmra.mxu1 %vm187_vm2, %v167_v24 }
  0x8f   :  { %v157_v36 = vpop.f32.mrf.mxu3 }
  0x90   :  { %v124_v25 = vpop.f32.mrf.mxu0  ;;  %v158_v38 = vadd.f32 %v675_v18, %v157_v36 }
  0x91   :  { %v125_v26 = vadd.f32 %v675_v18, %v124_v25 }
  0x92   :  { %v179_v39 = vmax.f32 %v158_v38, 0.0 }
  0x93   :  { %v168_v27 = vmax.f32 %v125_v26, 0.0 }
  0x94   :  { %504 = vmatmul.msk.f32.gmra.mxu3 %vm187_vm2, %v179_v39 }
  0x95   :  { %493 = vmatmul.msk.f32.gmra.mxu1 %vm187_vm2, %v168_v27 }
  0x97   :  { %v160_v42 = vpop.f32.mrf.mxu3 }
  0x98   :  { %v127_v28 = vpop.f32.mrf.mxu0  ;;  %v161_v44 = vadd.f32 %v675_v18, %v160_v42 }
  0x99   :  { %v128_v29 = vadd.f32 %v675_v18, %v127_v28 }
  0x9a   :  { %v180_v45 = vmax.f32 %v161_v44, 0.0 }
  0x9b   :  { %v169_v31 = vmax.f32 %v128_v29, 0.0 }
  0x9c   :  { %505 = vmatmul.msk.f32.gmra.mxu3 %vm187_vm2, %v180_v45 }
  0x9d   :  { %494 = vmatmul.msk.f32.gmra.mxu1 %vm187_vm2, %v169_v31 }
  0x9f   :  { %v163_v48 = vpop.f32.mrf.mxu3 }
  0xa0   :  { %v130_v34 = vpop.f32.mrf.mxu0  ;;  %v164_v50 = vadd.f32 %v675_v18, %v163_v48 }
  0xa1   :  { %v131_v35 = vadd.f32 %v675_v18, %v130_v34 }
  0xa2   :  { %v181_v51 = vmax.f32 %v164_v50, 0.0 }
  0xa3   :  { %v170_v37 = vmax.f32 %v131_v35, 0.0 }
  0xa4   :  { %506 = vmatmul.msk.f32.gmra.mxu3 %vm187_vm2, %v181_v51 }
  0xa5   :  { %495 = vmatmul.msk.f32.gmra.mxu1 %vm187_vm2, %v170_v37 }
  0xa8   :  { %v133_v40 = vpop.f32.mrf.mxu0 }
  0xa9   :  { %v134_v41 = vadd.f32 %v675_v18, %v133_v40 }
  0xab   :  { %v171_v43 = vmax.f32 %v134_v41, 0.0 }
  0xad   :  { %496 = vmatmul.msk.f32.gmra.mxu1 %vm187_vm2, %v171_v43 }
  0xb0   :  { %v136_v46 = vpop.f32.mrf.mxu0 }
  0xb1   :  { %v137_v47 = vadd.f32 %v675_v18, %v136_v46 }
  0xb3   :  { %v172_v49 = vmax.f32 %v137_v47, 0.0 }
  0xb5   :  { %497 = vmatmul.msk.f32.gmra.mxu1 %vm187_vm2, %v172_v49 }
  0xb8   :  { %v139_v52 = vpop.f32.mrf.mxu0 }
  0xb9   :  { %v140_v53 = vadd.f32 %v675_v18, %v139_v52 }
  0xbb   :  { %v173_v54 = vmax.f32 %v140_v53, 0.0  ;;  %v532_v53 = vld [vmem:[%s777_s6] ss:$0 sm:$0xff] }
  0xbd   :  { %498 = vmatmul.msk.f32.gmra.mxu1 %vm187_vm2, %v173_v54 }
  0xc0   :  { %v142_v55 = vpop.f32.mrf.mxu0 }
  0xc1   :  { %v143_v56 = vadd.f32 %v675_v18, %v142_v55 }
  0xc3   :  { %v174_v57 = vmax.f32 %v143_v56, 0.0 }
  0xc5   :  { %499 = vmatmul.msk.f32.gmra.mxu1 %vm187_vm2, %v174_v57 }
  0xc8   :  { %v145_v58 = vpop.f32.mrf.mxu0 }
  0xc9   :  { %v146_v59 = vadd.f32 %v675_v18, %v145_v58 }
  0xcb   :  { %v175_v60 = vmax.f32 %v146_v59, 0.0 }
  0xcd   :  { %500 = vmatmul.msk.f32.gmra.mxu1 %vm187_vm2, %v175_v60 }
  0xd0   :  { %v148_v61 = vpop.f32.mrf.mxu0 }
  0xd1   :  { %v149_v62 = vadd.f32 %v675_v18, %v148_v61 }
  0xd3   :  { %v176_v63 = vmax.f32 %v149_v62, 0.0 }
  0xd5   :  { %501 = vmatmul.msk.f32.gmra.mxu1 %vm187_vm2, %v176_v63 }
  0xd8   :  { %v151_v0 = vpop.f32.mrf.mxu0 }
  0xd9   :  { %v152_v1 = vadd.f32 %v675_v18, %v151_v0 }
  0xdb   :  { %v177_v2 = vmax.f32 %v152_v1, 0.0 }
  0xdd   :  { %502 = vmatmul.msk.f32.gmra.mxu1 %vm187_vm2, %v177_v2 }
 0x102   :  { %v253_v5 = vpop.f32.mrf.mxu1 }
 0x103   :  { %v254_v6 = vadd.f32 %v715_v4, %v253_v5 }
 0x105   :  { %v301_v7 = vmax.f32 %v254_v6, 0.0 }
 0x107   :  { %508 = vmatmul.msk.f32.vlgmr.msra.gmra.mxu2 %vm322_vm4, %v301_v7 }
 0x10a   :  { %v256_v8 = vpop.f32.mrf.mxu1 }
 0x10b   :  { %v257_v9 = vadd.f32 %v715_v4, %v256_v8 }
 0x10d   :  { %v302_v10 = vmax.f32 %v257_v9, 0.0 }
 0x10f   :  { %509 = vmatmul.msk.f32.gmra.mxu2 %vm322_vm4, %v302_v10  ;;  %v289_v18 = vpop.f32.mrf.mxu3 }
 0x110   :  { %v290_v20 = vadd.f32 %v715_v4, %v289_v18 }
 0x112   :  { %v259_v11 = vpop.f32.mrf.mxu1  ;;  %v313_v22 = vmax.f32 %v290_v20, 0.0 }
 0x113   :  { %v260_v12 = vadd.f32 %v715_v4, %v259_v11 }
 0x114   :  { %520 = vmatmul.msk.f32.vlgmr.msra.gmra.mxu3 %vm322_vm4, %v313_v22 }
 0x115   :  { %v303_v13 = vmax.f32 %v260_v12, 0.0 }
 0x117   :  { %510 = vmatmul.msk.f32.gmra.mxu2 %vm322_vm4, %v303_v13  ;;  %v292_v24 = vpop.f32.mrf.mxu3 }
 0x118   :  { %v293_v26 = vadd.f32 %v715_v4, %v292_v24 }
 0x11a   :  { %v262_v14 = vpop.f32.mrf.mxu1  ;;  %v314_v28 = vmax.f32 %v293_v26, 0.0 }
 0x11b   :  { %v263_v15 = vadd.f32 %v715_v4, %v262_v14 }
 0x11c   :  { %521 = vmatmul.msk.f32.gmra.mxu3 %vm322_vm4, %v314_v28 }
 0x11d   :  { %v304_v16 = vmax.f32 %v263_v15, 0.0 }
 0x11f   :  { %511 = vmatmul.msk.f32.gmra.mxu2 %vm322_vm4, %v304_v16  ;;  %v295_v30 = vpop.f32.mrf.mxu3 }
 0x120   :  { %v296_v32 = vadd.f32 %v715_v4, %v295_v30 }
 0x122   :  { %v265_v17 = vpop.f32.mrf.mxu1  ;;  %v315_v34 = vmax.f32 %v296_v32, 0.0 }
 0x123   :  { %v266_v19 = vadd.f32 %v715_v4, %v265_v17 }
 0x124   :  { %522 = vmatmul.msk.f32.gmra.mxu3 %vm322_vm4, %v315_v34 }
 0x125   :  { %v305_v21 = vmax.f32 %v266_v19, 0.0 }
 0x127   :  { %512 = vmatmul.msk.f32.gmra.mxu2 %vm322_vm4, %v305_v21  ;;  %v298_v36 = vpop.f32.mrf.mxu3 }
 0x128   :  { %v299_v38 = vadd.f32 %v715_v4, %v298_v36 }
 0x12a   :  { %v268_v23 = vpop.f32.mrf.mxu1  ;;  %v316_v40 = vmax.f32 %v299_v38, 0.0 }
 0x12b   :  { %v269_v25 = vadd.f32 %v715_v4, %v268_v23 }
 0x12c   :  { %523 = vmatmul.msk.f32.gmra.mxu3 %vm322_vm4, %v316_v40 }
 0x12d   :  { %v306_v27 = vmax.f32 %v269_v25, 0.0 }
 0x12f   :  { %513 = vmatmul.msk.f32.gmra.mxu2 %vm322_vm4, %v306_v27 }
 0x132   :  { %v271_v29 = vpop.f32.mrf.mxu1 }
 0x133   :  { %v272_v31 = vadd.f32 %v715_v4, %v271_v29 }
 0x135   :  { %v307_v33 = vmax.f32 %v272_v31, 0.0 }
 0x137   :  { %514 = vmatmul.msk.f32.gmra.mxu2 %vm322_vm4, %v307_v33 }
 0x13a   :  { %v274_v35 = vpop.f32.mrf.mxu1 }
 0x13b   :  { %v275_v37 = vadd.f32 %v715_v4, %v274_v35 }
 0x13d   :  { %v308_v39 = vmax.f32 %v275_v37, 0.0 }
 0x13f   :  { %515 = vmatmul.msk.f32.gmra.mxu2 %vm322_vm4, %v308_v39 }
 0x142   :  { %v277_v41 = vpop.f32.mrf.mxu1 }
 0x143   :  { %v278_v42 = vadd.f32 %v715_v4, %v277_v41 }
 0x145   :  { %v309_v43 = vmax.f32 %v278_v42, 0.0 }
 0x147   :  { %516 = vmatmul.msk.f32.gmra.mxu2 %vm322_vm4, %v309_v43 }
 0x14a   :  { %v280_v44 = vpop.f32.mrf.mxu1 }
 0x14b   :  { %v281_v45 = vadd.f32 %v715_v4, %v280_v44 }
 0x14d   :  { %v310_v46 = vmax.f32 %v281_v45, 0.0 }
 0x14f   :  { %517 = vmatmul.msk.f32.gmra.mxu2 %vm322_vm4, %v310_v46 }
 0x152   :  { %v283_v47 = vpop.f32.mrf.mxu1 }
 0x153   :  { %v284_v48 = vadd.f32 %v715_v4, %v283_v47 }
 0x155   :  { %v311_v49 = vmax.f32 %v284_v48, 0.0 }
 0x157   :  { %518 = vmatmul.msk.f32.gmra.mxu2 %vm322_vm4, %v311_v49 }
 0x15a   :  { %v286_v50 = vpop.f32.mrf.mxu1 }
 0x15b   :  { %v287_v51 = vadd.f32 %v715_v4, %v286_v50 }
 0x15d   :  { %v312_v52 = vmax.f32 %v287_v51, 0.0 }
 0x15f   :  { %519 = vmatmul.msk.f32.gmra.mxu2 %vm322_vm4, %v312_v52 }
 0x18a   :  { %v392_v54 = vpop.f32.mrf.mxu2 }
 0x18b   :  { %v393_v55 = vadd.f32 %v532_v53, %v392_v54 }
 0x18d   :  { %440 = vst.msk [vmem:[#allocation2] sm:$0xff] %vm322_vm4, %v393_v55 }
 0x192   :  { %v395_v56 = vpop.f32.mrf.mxu2 }
 0x193   :  { %v396_v57 = vadd.f32 %v532_v53, %v395_v56 }
 0x195   :  { %441 = vst.msk [vmem:[#allocation2 + $0x8] sm:$0xff] %vm322_vm4, %v396_v57 }
 0x197   :  { %v428_v63 = vpop.f32.mrf.mxu3 }
 0x198   :  { %v429_v1 = vadd.f32 %v532_v53, %v428_v63 }
 0x19a   :  { %v398_v58 = vpop.f32.mrf.mxu2  ;;  %452 = vst.msk [vmem:[#allocation2 + $0x60] sm:$0xff] %vm322_vm4, %v429_v1 }
 0x19b   :  { %v399_v59 = vadd.f32 %v532_v53, %v398_v58 }
 0x19d   :  { %442 = vst.msk [vmem:[#allocation2 + $0x10] sm:$0xff] %vm322_vm4, %v399_v59 }
 0x19f   :  { %v431_v3 = vpop.f32.mrf.mxu3 }
 0x1a0   :  { %v432_v5 = vadd.f32 %v532_v53, %v431_v3 }
 0x1a2   :  { %v401_v60 = vpop.f32.mrf.mxu2  ;;  %453 = vst.msk [vmem:[#allocation2 + $0x68] sm:$0xff] %vm322_vm4, %v432_v5 }
 0x1a3   :  { %v402_v61 = vadd.f32 %v532_v53, %v401_v60 }
 0x1a5   :  { %443 = vst.msk [vmem:[#allocation2 + $0x18] sm:$0xff] %vm322_vm4, %v402_v61 }
 0x1a7   :  { %v434_v7 = vpop.f32.mrf.mxu3 }
 0x1a8   :  { %v435_v9 = vadd.f32 %v532_v53, %v434_v7 }
 0x1aa   :  { %v404_v62 = vpop.f32.mrf.mxu2  ;;  %454 = vst.msk [vmem:[#allocation2 + $0x70] sm:$0xff] %vm322_vm4, %v435_v9 }
 0x1ab   :  { %v405_v0 = vadd.f32 %v532_v53, %v404_v62 }
 0x1ad   :  { %444 = vst.msk [vmem:[#allocation2 + $0x20] sm:$0xff] %vm322_vm4, %v405_v0 }
 0x1af   :  { %v437_v11 = vpop.f32.mrf.mxu3 }
 0x1b0   :  { %v438_v13 = vadd.f32 %v532_v53, %v437_v11 }
 0x1b2   :  { %v407_v2 = vpop.f32.mrf.mxu2  ;;  %455 = vst.msk [vmem:[#allocation2 + $0x78] sm:$0xff] %vm322_vm4, %v438_v13 }
 0x1b3   :  { %v408_v4 = vadd.f32 %v532_v53, %v407_v2 }
 0x1b5   :  { %445 = vst.msk [vmem:[#allocation2 + $0x28] sm:$0xff] %vm322_vm4, %v408_v4 }
 0x1ba   :  { %v410_v6 = vpop.f32.mrf.mxu2 }
 0x1bb   :  { %v411_v8 = vadd.f32 %v532_v53, %v410_v6 }
 0x1bd   :  { %446 = vst.msk [vmem:[#allocation2 + $0x30] sm:$0xff] %vm322_vm4, %v411_v8 }
 0x1c2   :  { %v413_v10 = vpop.f32.mrf.mxu2 }
 0x1c3   :  { %v414_v12 = vadd.f32 %v532_v53, %v413_v10 }
 0x1c5   :  { %447 = vst.msk [vmem:[#allocation2 + $0x38] sm:$0xff] %vm322_vm4, %v414_v12 }
 0x1ca   :  { %v416_v14 = vpop.f32.mrf.mxu2 }
 0x1cb   :  { %v417_v15 = vadd.f32 %v532_v53, %v416_v14 }
 0x1cd   :  { %448 = vst.msk [vmem:[#allocation2 + $0x40] sm:$0xff] %vm322_vm4, %v417_v15 }
 0x1d2   :  { %v419_v16 = vpop.f32.mrf.mxu2 }
 0x1d3   :  { %v420_v17 = vadd.f32 %v532_v53, %v419_v16 }
 0x1d5   :  { %449 = vst.msk [vmem:[#allocation2 + $0x48] sm:$0xff] %vm322_vm4, %v420_v17 }
 0x1da   :  { %v422_v18 = vpop.f32.mrf.mxu2 }
 0x1db   :  { %v423_v19 = vadd.f32 %v532_v53, %v422_v18 }
 0x1dd   :  { %450 = vst.msk [vmem:[#allocation2 + $0x50] sm:$0xff] %vm322_vm4, %v423_v19 }
 0x1e2   :  { %v425_v20 = vpop.f32.mrf.mxu2 }
 0x1e3   :  { %v426_v21 = vadd.f32 %v532_v53, %v425_v20 }
 0x1e5   :  { %451 = vst.msk [vmem:[#allocation2 + $0x58] sm:$0xff] %vm322_vm4, %v426_v21 }
 0x1e6   :  { %459 = vsyncadd [#allocation3], 2016  ;;  %s462_s16 = sshll.u32 %s778_s7, 4  ;;  %s559_s17 = smov [#allocation2]   ;;  %s463_s16 = int_to_ptr.hbm [resolvable:$true] %s462_s16 }
 0x1e7   :  { %s460_s18 = sshll.u32 %s559_s17, 4  ;;  %s560_s19 = smov 32   ;;  %s461_s18 = int_to_ptr.vmem [resolvable:$true] %s460_s18 }
 0x1e8   :  { %s561_s20 = smov 2  }
 0x1e9   :  { %468 = dma.vmem_to_hbm [thread:$0]  %s461_s18, 32, %s463_s16, [#allocation3], %s560_s19, %s560_s19, %s561_s20  }
 0x1ea   :  { %557 = dma.done.wait [#allocation3], 2048  }
 0x1eb   :  { %558 = vsyncadd [#allocation3], 4294965248 }
 0x1ec   :  { %473 = vsyncpa [#allocation3], 1 }

</bundles_post_ra>
